<compile_context>
chip_gen: v6e
topology: v6e:2x2x1
jax: 0.10.0
libtpu: 0.0.40
codegen_flags: <defaults>
</compile_context>

<pallas_src>
import functools

import jax
import jax.numpy as jnp
from jax.experimental import pallas as pl
from jax.experimental.pallas import tpu as pltpu

LN_EPS = 1e-5  # torch.nn.LayerNorm default


def _round_up(x, m):
    return (x + m - 1) // m * m


# ---------------------------------------------------------------------------
# Hardware introspection (generation-aware tiling / VMEM budget).
# ---------------------------------------------------------------------------
def _tpu_info():
    try:
        return pltpu.get_tpu_info()
    except Exception:
        return None


def _device_kind():
    try:
        return jax.devices()[0].device_kind.lower()
    except Exception:
        return ""


def _int_attr(obj, names):
    for name in names:
        v = getattr(obj, name, None)
        if v is None:
            continue
        try:
            v = int(v)
        except (TypeError, ValueError):
            continue
        if v > 0:
            return v
    return None


@functools.lru_cache(maxsize=1)
def _vmem_capacity_bytes():
    v = _int_attr(_tpu_info(), ("vmem_capacity_bytes", "vmem_bytes", "vmem_size_bytes"))
    if v is not None:
        return v
    return 64 * 2**20 if "v7" in _device_kind() else 128 * 2**20


@functools.lru_cache(maxsize=1)
def _num_tensorcores():
    v = _int_attr(_tpu_info(), ("num_cores", "tensorcores_per_chip", "num_tensorcores"))
    if v is not None and v <= 8:
        return v
    return 2 if "v7" in _device_kind() else 1


# ---------------------------------------------------------------------------
# Feature detection: pl.Buffered(1) single-buffering of grid-invariant operands.
# ---------------------------------------------------------------------------
_BUFFERED_PARAMS_OK = None


def _single_buffer_supported():
    """Probe once whether pipeline_mode=pl.Buffered(1) compiles on this JAX/TPU build."""
    global _BUFFERED_PARAMS_OK
    if _BUFFERED_PARAMS_OK is not None:
        return _BUFFERED_PARAMS_OK
    if not hasattr(pl, "Buffered"):
        _BUFFERED_PARAMS_OK = False
        return False
    try:
        def _probe_kernel(c_ref, x_ref, o_ref):
            o_ref[...] = x_ref[...] + c_ref[...]

        probe = pl.pallas_call(
            _probe_kernel,
            out_shape=jax.ShapeDtypeStruct((16, 128), jnp.float32),
            grid_spec=pltpu.PrefetchScalarGridSpec(
                num_scalar_prefetch=0,
                grid=(2,),
                in_specs=[
                    pl.BlockSpec((8, 128), lambda i: (0, 0),
                                 pipeline_mode=pl.Buffered(1)),
                    pl.BlockSpec((8, 128), lambda i: (i, 0)),
                ],
                out_specs=pl.BlockSpec((8, 128), lambda i: (i, 0)),
            ),
        )
        jax.block_until_ready(
            probe(jnp.zeros((8, 128), jnp.float32), jnp.zeros((16, 128), jnp.float32)))
        _BUFFERED_PARAMS_OK = True
    except Exception:
        _BUFFERED_PARAMS_OK = False
    return _BUFFERED_PARAMS_OK


# ---------------------------------------------------------------------------
# Kernel bodies.
# ---------------------------------------------------------------------------
def _layer_body(x, w_ref, b_ref, g_ref, be_ref, *, inv_e, eps, true_e):
    """One Linear -> LayerNorm -> ReLU layer on a (TM, E_pad) row tile.

    Feature dims are zero-padded to 128 lanes; padded weight cols / bias / gamma / beta
    are zero, so padded activation columns stay exactly 0 through every layer and the
    LN statistics (divided by the TRUE embed dim) are exact.
    """
    w = w_ref[...]
    # MXU matmul in the weights' storage dtype (bf16 by default), f32 accumulation.
    h = jnp.dot(x.astype(w.dtype), w, preferred_element_type=jnp.float32)
    h = h + b_ref[...].astype(jnp.float32)

    # Two-pass LayerNorm statistics (numerically safe; torch semantics: biased var,
    # eps inside rsqrt). Padded lanes are masked out of the variance reduction.
    mu = jnp.sum(h, axis=-1, keepdims=True) * inv_e
    d = h - mu
    if h.shape[-1] != true_e:
        col = jax.lax.broadcasted_iota(jnp.int32, h.shape, 1)
        dm = jnp.where(col < true_e, d, 0.0)
    else:
        dm = d
    var = jnp.sum(dm * dm, axis=-1, keepdims=True) * inv_e

    h = d * jax.lax.rsqrt(var + eps)
    h = h * g_ref[...].astype(jnp.float32) + be_ref[...].astype(jnp.float32)
    return jnp.maximum(h, 0.0)


def _fused2_kernel(x_ref,
                   w1_ref, b1_ref, g1_ref, be1_ref,
                   w2_ref, b2_ref, g2_ref, be2_ref,
                   o_ref, *, inv_e, eps, true_e):
    h = _layer_body(x_ref[...], w1_ref, b1_ref, g1_ref, be1_ref,
                    inv_e=inv_e, eps=eps, true_e=true_e)
    h = _layer_body(h, w2_ref, b2_ref, g2_ref, be2_ref,
                    inv_e=inv_e, eps=eps, true_e=true_e)
    o_ref[...] = h.astype(o_ref.dtype)


def _single_layer_kernel(x_ref, w_ref, b_ref, g_ref, be_ref, o_ref, *, inv_e, eps, true_e):
    h = _layer_body(x_ref[...], w_ref, b_ref, g_ref, be_ref,
                    inv_e=inv_e, eps=eps, true_e=true_e)
    o_ref[...] = h.astype(o_ref.dtype)


# ---------------------------------------------------------------------------
# Parameter preparation (hoist pad + cast out of the per-call hot path).
# ---------------------------------------------------------------------------
def prepare_params(params, *, compute_dtype=jnp.bfloat16):
    """Pad weights to 128-lane multiples and cast them to the MXU compute dtype once.

    Biases / LN vectors stay f32 (padded with zeros). soft_prompt_forward() detects
    already-prepared params and skips all per-call padding / casting work.
    """
    w1, b1, g1, be1, w2, b2, g2, be2 = params
    cdt = jnp.dtype(compute_dtype)
    in_dim, embed_dim = w1.shape
    k_pad, e_pad = _round_up(in_dim, 128), _round_up(embed_dim, 128)

    def pad_w(w, rows, cols):
        w = w.astype(cdt)
        if w.shape != (rows, cols):
            w = jnp.pad(w, ((0, rows - w.shape[0]), (0, cols - w.shape[1])))
        return w

    def pad_v(v):
        v = v.astype(jnp.float32).reshape(1, -1)
        if v.shape[1] != e_pad:
            v = jnp.pad(v, ((0, 0), (0, e_pad - v.shape[1])))
        return v

    return (pad_w(w1, k_pad, e_pad), pad_v(b1), pad_v(g1), pad_v(be1),
            pad_w(w2, e_pad, e_pad), pad_v(b2), pad_v(g2), pad_v(be2))


# ---------------------------------------------------------------------------
# Forward.
# ---------------------------------------------------------------------------
def soft_prompt_forward(inputs, params, *, embed_dim=None, tile_m=256,
                        compute_dtype=jnp.bfloat16, single_buffer_params=None):
    """inputs: (b, s, in_dim). Returns ((b, s, embed_dim), None, None).

    params: raw tuple (w1,b1,g1,be1,w2,b2,g2,be2) or the output of prepare_params().
            If pre-padded params are passed, `embed_dim` must be given explicitly.
    compute_dtype: dtype fed to the MXU for x / W (default bf16; f32 accumulation).
    """
    b, s, in_dim = inputs.shape
    w1 = params[0]
    if embed_dim is None:
        embed_dim = int(w1.shape[1])  # valid for unpadded params
    cdt = jnp.dtype(compute_dtype)
    out_dt = inputs.dtype

    # ---- Parameter padding / casting (no-op when already prepared).
    w1p, b1p, g1p, be1p, w2p, b2p, g2p, be2p = prepare_params(params, compute_dtype=cdt)

    k_pad = _round_up(in_dim, 128)
    e_pad = _round_up(embed_dim, 128)

    # ---- Buffering of grid-invariant params.
    use_single_buffer = (_single_buffer_supported() if single_buffer_params is None
                         else bool(single_buffer_params))

    # ---- Generation-aware row tiling.
    n = b * s
    cores = _num_tensorcores()
    tile_m_req = max(8, _round_up(int(tile_m), 8))
    if cores > 1 and n > 8:
        # Only force multiple grid steps when the chip actually has >1 TensorCore (v7x);
        # on single-TC chips (v5e/v6e) a bigger tile amortizes per-step overhead.
        tile_m_req = min(tile_m_req, max(8, _round_up(pl.cdiv(n, cores), 8)))
    tile_m_eff = min(tile_m_req, _round_up(n, 8))

    # ---- VMEM budget (clamped to the queried per-core capacity: 64 MiB on v7x).
    vmem_cap = _vmem_capacity_bytes()
    budget = int(vmem_cap * 0.85)
    csz = cdt.itemsize
    xsz = jnp.dtype(inputs.dtype).itemsize
    osz = jnp.dtype(out_dt).itemsize
    f32 = 4
    nbuf_p = 1 if use_single_buffer else 2

    def est_bytes(tm, weight_elems, n_vecs, in_k, in_itemsize, out_itemsize):
        return (2 * tm * in_k * in_itemsize          # x tile (double buffered)
                + 2 * tm * e_pad * out_itemsize      # out tile (double buffered)
                + nbuf_p * weight_elems * csz        # resident weights
                + nbuf_p * n_vecs * e_pad * f32      # biases + LN vectors
                + 4 * tm * e_pad * f32)              # in-kernel f32 temporaries

    fused_w_elems = k_pad * e_pad + e_pad * e_pad
    # Shrink the row tile (256 -> 128) before giving up on the fused kernel (v7x 64 MiB).
    while tile_m_eff > 128 and est_bytes(tile_m_eff, fused_w_elems, 6, k_pad, xsz, osz) > budget:
        tile_m_eff = max(128, _round_up(tile_m_eff // 2, 8))
    fused_fits = est_bytes(tile_m_eff, fused_w_elems, 6, k_pad, xsz, osz) <= budget

    n_pad = _round_up(n, tile_m_eff)
    grid = n_pad // tile_m_eff

    # ---- Activations: pass x in its original dtype; pad only when needed.
    x2 = inputs.reshape(n, in_dim)
    if n_pad != n or k_pad != in_dim:
        x2 = jnp.pad(x2, ((0, n_pad - n), (0, k_pad - in_dim)))

    rows = lambda i: (i, 0)
    const = lambda i: (0, 0)

    def param_spec(shape):
        if use_single_buffer:
            # Grid-invariant operand: one VMEM buffer is enough (halves weight footprint).
            return pl.BlockSpec(shape, const, pipeline_mode=pl.Buffered(1))
        return pl.BlockSpec(shape, const)

    def vmem_limit(est):
        return int(min(max(est * 1.4, 32 * 2**20), budget))

    cost = pl.CostEstimate(
        flops=2 * n * (in_dim * embed_dim + embed_dim * embed_dim),
        transcendentals=2 * n,
        bytes_accessed=(n * in_dim * xsz + fused_w_elems * csz
                        + 6 * e_pad * f32 + n * embed_dim * osz))

    compiler = lambda est: pltpu.CompilerParams(
        dimension_semantics=("parallel",), vmem_limit_bytes=vmem_limit(est))

    if fused_fits:
        kernel = functools.partial(_fused2_kernel, inv_e=1.0 / float(embed_dim),
                                   eps=LN_EPS, true_e=embed_dim)
        out = pl.pallas_call(
            kernel,
            out_shape=jax.ShapeDtypeStruct((n_pad, e_pad), out_dt),
            grid_spec=pltpu.PrefetchScalarGridSpec(
                num_scalar_prefetch=0,
                grid=(grid,),
                in_specs=[
                    pl.BlockSpec((tile_m_eff, k_pad), rows),
                    param_spec((k_pad, e_pad)), param_spec((1, e_pad)),
                    param_spec((1, e_pad)), param_spec((1, e_pad)),
                    param_spec((e_pad, e_pad)), param_spec((1, e_pad)),
                    param_spec((1, e_pad)), param_spec((1, e_pad)),
                ],
                out_specs=pl.BlockSpec((tile_m_eff, e_pad), rows),
            ),
            compiler_params=compiler(est_bytes(tile_m_eff, fused_w_elems, 6, k_pad, xsz, osz)),
            cost_estimate=cost,
        )(x2, w1p, b1p, g1p, be1p, w2p, b2p, g2p, be2p)
    else:
        # Large-embed fallback: keep only one weight matrix resident at a time.
        # TODO(synk): for embed dims where even a single layer's weight exceeds the VMEM
        # budget, stream the contraction over a K-axis grid with an accumulator scratch.
        def run_layer(xin, wp, bp, gp, bep, out_dtype):
            kp = int(xin.shape[1])
            in_isz = jnp.dtype(xin.dtype).itemsize
            out_isz = jnp.dtype(out_dtype).itemsize
            est = est_bytes(tile_m_eff, kp * e_pad, 3, kp, in_isz, out_isz)
            kernel = functools.partial(_single_layer_kernel, inv_e=1.0 / float(embed_dim),
                                       eps=LN_EPS, true_e=embed_dim)
            return pl.pallas_call(
                kernel,
                out_shape=jax.ShapeDtypeStruct((n_pad, e_pad), out_dtype),
                grid_spec=pltpu.PrefetchScalarGridSpec(
                    num_scalar_prefetch=0,
                    grid=(grid,),
                    in_specs=[
                        pl.BlockSpec((tile_m_eff, kp), rows),
                        param_spec((kp, e_pad)), param_spec((1, e_pad)),
                        param_spec((1, e_pad)), param_spec((1, e_pad)),
                    ],
                    out_specs=pl.BlockSpec((tile_m_eff, e_pad), rows),
                ),
                compiler_params=compiler(est),
            )(xin, wp, bp, gp, bep)

        h = run_layer(x2, w1p, b1p, g1p, be1p, jnp.float32)
        out = run_layer(h, w2p, b2p, g2p, be2p, out_dt)

    if n_pad != n or e_pad != embed_dim:
        out = out[:n, :embed_dim]
    out = out.reshape(b, s, embed_dim)
    return out, None, None


# ---------------------------------------------------------------------------
# Synthetic init + reference.
# ---------------------------------------------------------------------------
def init_params(key, in_dim, embed_dim):
    """Deterministic synthetic parameter init (shapes match the PyTorch module)."""
    k1, k2, k3, k4 = jax.random.split(key, 4)
    # Linear weights stored pre-transposed as (in, out); biases / LN params as (1, out).
    w1 = jax.random.normal(k1, (in_dim, embed_dim), jnp.float32) * (1.0 / jnp.sqrt(in_dim))
    b1 = jax.random.normal(k2, (1, embed_dim), jnp.float32) * 0.01
    g1 = jnp.ones((1, embed_dim), jnp.float32)
    be1 = jnp.zeros((1, embed_dim), jnp.float32)
    w2 = jax.random.normal(k3, (embed_dim, embed_dim), jnp.float32) * (1.0 / jnp.sqrt(embed_dim))
    b2 = jax.random.normal(k4, (1, embed_dim), jnp.float32) * 0.01
    g2 = jnp.ones((1, embed_dim), jnp.float32)
    be2 = jnp.zeros((1, embed_dim), jnp.float32)
    return (w1, b1, g1, be1, w2, b2, g2, be2)


def _reference(inputs, params, *, compute_dtype=jnp.float32):
    """Pure-JAX reference (two-pass LN, torch semantics). Matmul operands cast to
    compute_dtype with f32 accumulation, mirroring the kernel's MXU math."""
    w1, b1, g1, be1, w2, b2, g2, be2 = params
    b, s, _ = inputs.shape
    x = inputs.reshape(b * s, -1)
    cdt = jnp.dtype(compute_dtype)

    def layer(x, w, bb, g, be):
        h = jnp.dot(x.astype(cdt), w.astype(cdt), preferred_element_type=jnp.float32)
        h = h + bb
        mu = h.mean(-1, keepdims=True)
        var = ((h - mu) ** 2).mean(-1, keepdims=True)
        h = (h - mu) / jnp.sqrt(var + LN_EPS) * g + be
        return jnp.maximum(h, 0.0)

    h = layer(x, w1, b1, g1, be1)
    h = layer(h, w2, b2, g2, be2)
    return h.reshape(b, s, -1)


if __name__ == "__main__":
    # Small shapes consistent with the module's (b, s, e) input convention.
    B, S, IN_DIM, EMBED_DIM = 2, 8, 32, 32

    key = jax.random.PRNGKey(0)
    k_x, k_p = jax.random.split(key)
    inputs = jax.random.normal(k_x, (B, S, IN_DIM), jnp.float32)
    params = init_params(k_p, IN_DIM, EMBED_DIM)

    # Pad + bf16-cast the parameters ONCE, outside the jitted hot path.
    prepared = prepare_params(params, compute_dtype=jnp.bfloat16)

    fwd = jax.jit(functools.partial(soft_prompt_forward, embed_dim=EMBED_DIM,
                                    compute_dtype=jnp.bfloat16))
    out, aux1, aux2 = fwd(inputs, prepared)
    out = jax.block_until_ready(out)

    ref = _reference(inputs, params, compute_dtype=jnp.bfloat16)
    assert out.shape == (B, S, EMBED_DIM), out.shape
    assert aux1 is None and aux2 is None
    # Kernel and reference both do bf16 MXU ops with f32 accumulation; only the
    # accumulation grouping differs.
    err = float(jnp.max(jnp.abs(out - ref)))
    assert jnp.allclose(out, ref, atol=1e-3, rtol=1e-3), f"mismatch vs reference: {err}"

    print("KERNEL_OK")
</pallas_src>

<mosaic_0001>
module attributes {stable_mosaic.version = 11 : i64} {
  func.func @_fused2_kernel(%arg0: i32, %arg1: memref<16x128xf32, #tpu.memory_space<vmem>>, %arg2: memref<128x128xbf16, #tpu.memory_space<vmem>>, %arg3: memref<1x128xf32, #tpu.memory_space<vmem>>, %arg4: memref<1x128xf32, #tpu.memory_space<vmem>>, %arg5: memref<1x128xf32, #tpu.memory_space<vmem>>, %arg6: memref<128x128xbf16, #tpu.memory_space<vmem>>, %arg7: memref<1x128xf32, #tpu.memory_space<vmem>>, %arg8: memref<1x128xf32, #tpu.memory_space<vmem>>, %arg9: memref<1x128xf32, #tpu.memory_space<vmem>>, %arg10: memref<16x128xf32, #tpu.memory_space<vmem>>) attributes {dimension_semantics = [#tpu.dimension_semantics<parallel>], iteration_bounds = array<i64: 1>, scalar_prefetch = 0 : i64, scratch_operands = 0 : i64, tpu.core_type = #tpu.core_type<tc>, window_params = [{transform_indices = @transform_0, window_bounds = array<i64: 16, 128>}, {pipeline_mode = #tpu.pipeline_mode<synchronous>, transform_indices = @transform_1, window_bounds = array<i64: 128, 128>}, {pipeline_mode = #tpu.pipeline_mode<synchronous>, transform_indices = @transform_2, window_bounds = array<i64: 1, 128>}, {pipeline_mode = #tpu.pipeline_mode<synchronous>, transform_indices = @transform_3, window_bounds = array<i64: 1, 128>}, {pipeline_mode = #tpu.pipeline_mode<synchronous>, transform_indices = @transform_4, window_bounds = array<i64: 1, 128>}, {pipeline_mode = #tpu.pipeline_mode<synchronous>, transform_indices = @transform_5, window_bounds = array<i64: 128, 128>}, {pipeline_mode = #tpu.pipeline_mode<synchronous>, transform_indices = @transform_6, window_bounds = array<i64: 1, 128>}, {pipeline_mode = #tpu.pipeline_mode<synchronous>, transform_indices = @transform_7, window_bounds = array<i64: 1, 128>}, {pipeline_mode = #tpu.pipeline_mode<synchronous>, transform_indices = @transform_8, window_bounds = array<i64: 1, 128>}, {transform_indices = @transform_9, window_bounds = array<i64: 16, 128>}]} {
    %c0 = arith.constant 0 : index
    %c0_0 = arith.constant 0 : index
    %0 = vector.load %arg1[%c0, %c0_0] : memref<16x128xf32, #tpu.memory_space<vmem>>, vector<16x128xf32>
    %c0_1 = arith.constant 0 : index
    %c0_2 = arith.constant 0 : index
    %1 = vector.load %arg2[%c0_1, %c0_2] : memref<128x128xbf16, #tpu.memory_space<vmem>>, vector<128x128xbf16>
    %2 = arith.truncf %0 : vector<16x128xf32> to vector<16x128xbf16>
    %cst = arith.constant dense<0.000000e+00> : vector<16x128xf32>
    %3 = tpu.matmul %2, %1, %cst {dimension_numbers = #tpu.dot_dimension_numbers<[1], [0], [0], [1], [0, 0, 1, 1], [], []>} : vector<16x128xbf16>, vector<128x128xbf16>, vector<16x128xf32> -> vector<16x128xf32>
    %c0_3 = arith.constant 0 : index
    %c0_4 = arith.constant 0 : index
    %4 = vector.load %arg3[%c0_3, %c0_4] : memref<1x128xf32, #tpu.memory_space<vmem>>, vector<1x128xf32>
    %5 = vector.broadcast %4 : vector<1x128xf32> to vector<16x128xf32>
    %6 = arith.addf %3, %5 : vector<16x128xf32>
    %cst_5 = arith.constant dense<0.000000e+00> : vector<16xf32>
    %7 = vector.multi_reduction <add>, %6, %cst_5 [1] : vector<16x128xf32> to vector<16xf32>
    %8 = vector.shape_cast %7 : vector<16xf32> to vector<16x1xf32>
    %cst_6 = arith.constant 3.125000e-02 : f32
    %9 = vector.broadcast %cst_6 : f32 to vector<16x1xf32>
    %10 = arith.mulf %8, %9 : vector<16x1xf32>
    %11 = vector.broadcast %10 : vector<16x1xf32> to vector<16x128xf32>
    %12 = arith.subf %6, %11 : vector<16x128xf32>
    %13 = tpu.iota {dimensions = array<i32: 1>} : vector<16x128xi32>
    %c32_i32 = arith.constant 32 : i32
    %14 = vector.broadcast %c32_i32 : i32 to vector<16x128xi32>
    %15 = arith.cmpi slt, %13, %14 : vector<16x128xi32>
    %cst_7 = arith.constant 0.000000e+00 : f32
    %16 = vector.broadcast %cst_7 : f32 to vector<16x128xf32>
    %17 = arith.select %15, %12, %16 : vector<16x128xi1>, vector<16x128xf32>
    %18 = arith.mulf %17, %17 : vector<16x128xf32>
    %cst_8 = arith.constant dense<0.000000e+00> : vector<16xf32>
    %19 = vector.multi_reduction <add>, %18, %cst_8 [1] : vector<16x128xf32> to vector<16xf32>
    %20 = vector.shape_cast %19 : vector<16xf32> to vector<16x1xf32>
    %cst_9 = arith.constant 3.125000e-02 : f32
    %21 = vector.broadcast %cst_9 : f32 to vector<16x1xf32>
    %22 = arith.mulf %20, %21 : vector<16x1xf32>
    %cst_10 = arith.constant 9.99999974E-6 : f32
    %23 = vector.broadcast %cst_10 : f32 to vector<16x1xf32>
    %24 = arith.addf %22, %23 : vector<16x1xf32>
    %25 = math.rsqrt %24 : vector<16x1xf32>
    %26 = vector.broadcast %25 : vector<16x1xf32> to vector<16x128xf32>
    %27 = arith.mulf %12, %26 : vector<16x128xf32>
    %c0_11 = arith.constant 0 : index
    %c0_12 = arith.constant 0 : index
    %28 = vector.load %arg4[%c0_11, %c0_12] : memref<1x128xf32, #tpu.memory_space<vmem>>, vector<1x128xf32>
    %29 = vector.broadcast %28 : vector<1x128xf32> to vector<16x128xf32>
    %30 = arith.mulf %27, %29 : vector<16x128xf32>
    %c0_13 = arith.constant 0 : index
    %c0_14 = arith.constant 0 : index
    %31 = vector.load %arg5[%c0_13, %c0_14] : memref<1x128xf32, #tpu.memory_space<vmem>>, vector<1x128xf32>
    %32 = vector.broadcast %31 : vector<1x128xf32> to vector<16x128xf32>
    %33 = arith.addf %30, %32 : vector<16x128xf32>
    %cst_15 = arith.constant 0.000000e+00 : f32
    %34 = vector.broadcast %cst_15 : f32 to vector<16x128xf32>
    %35 = arith.maximumf %33, %34 : vector<16x128xf32>
    %c0_16 = arith.constant 0 : index
    %c0_17 = arith.constant 0 : index
    %36 = vector.load %arg6[%c0_16, %c0_17] : memref<128x128xbf16, #tpu.memory_space<vmem>>, vector<128x128xbf16>
    %37 = arith.truncf %35 : vector<16x128xf32> to vector<16x128xbf16>
    %cst_18 = arith.constant dense<0.000000e+00> : vector<16x128xf32>
    %38 = tpu.matmul %37, %36, %cst_18 {dimension_numbers = #tpu.dot_dimension_numbers<[1], [0], [0], [1], [0, 0, 1, 1], [], []>} : vector<16x128xbf16>, vector<128x128xbf16>, vector<16x128xf32> -> vector<16x128xf32>
    %c0_19 = arith.constant 0 : index
    %c0_20 = arith.constant 0 : index
    %39 = vector.load %arg7[%c0_19, %c0_20] : memref<1x128xf32, #tpu.memory_space<vmem>>, vector<1x128xf32>
    %40 = vector.broadcast %39 : vector<1x128xf32> to vector<16x128xf32>
    %41 = arith.addf %38, %40 : vector<16x128xf32>
    %cst_21 = arith.constant dense<0.000000e+00> : vector<16xf32>
    %42 = vector.multi_reduction <add>, %41, %cst_21 [1] : vector<16x128xf32> to vector<16xf32>
    %43 = vector.shape_cast %42 : vector<16xf32> to vector<16x1xf32>
    %cst_22 = arith.constant 3.125000e-02 : f32
    %44 = vector.broadcast %cst_22 : f32 to vector<16x1xf32>
    %45 = arith.mulf %43, %44 : vector<16x1xf32>
    %46 = vector.broadcast %45 : vector<16x1xf32> to vector<16x128xf32>
    %47 = arith.subf %41, %46 : vector<16x128xf32>
    %48 = tpu.iota {dimensions = array<i32: 1>} : vector<16x128xi32>
    %c32_i32_23 = arith.constant 32 : i32
    %49 = vector.broadcast %c32_i32_23 : i32 to vector<16x128xi32>
    %50 = arith.cmpi slt, %48, %49 : vector<16x128xi32>
    %cst_24 = arith.constant 0.000000e+00 : f32
    %51 = vector.broadcast %cst_24 : f32 to vector<16x128xf32>
    %52 = arith.select %50, %47, %51 : vector<16x128xi1>, vector<16x128xf32>
    %53 = arith.mulf %52, %52 : vector<16x128xf32>
    %cst_25 = arith.constant dense<0.000000e+00> : vector<16xf32>
    %54 = vector.multi_reduction <add>, %53, %cst_25 [1] : vector<16x128xf32> to vector<16xf32>
    %55 = vector.shape_cast %54 : vector<16xf32> to vector<16x1xf32>
    %cst_26 = arith.constant 3.125000e-02 : f32
    %56 = vector.broadcast %cst_26 : f32 to vector<16x1xf32>
    %57 = arith.mulf %55, %56 : vector<16x1xf32>
    %cst_27 = arith.constant 9.99999974E-6 : f32
    %58 = vector.broadcast %cst_27 : f32 to vector<16x1xf32>
    %59 = arith.addf %57, %58 : vector<16x1xf32>
    %60 = math.rsqrt %59 : vector<16x1xf32>
    %61 = vector.broadcast %60 : vector<16x1xf32> to vector<16x128xf32>
    %62 = arith.mulf %47, %61 : vector<16x128xf32>
    %c0_28 = arith.constant 0 : index
    %c0_29 = arith.constant 0 : index
    %63 = vector.load %arg8[%c0_28, %c0_29] : memref<1x128xf32, #tpu.memory_space<vmem>>, vector<1x128xf32>
    %64 = vector.broadcast %63 : vector<1x128xf32> to vector<16x128xf32>
    %65 = arith.mulf %62, %64 : vector<16x128xf32>
    %c0_30 = arith.constant 0 : index
    %c0_31 = arith.constant 0 : index
    %66 = vector.load %arg9[%c0_30, %c0_31] : memref<1x128xf32, #tpu.memory_space<vmem>>, vector<1x128xf32>
    %67 = vector.broadcast %66 : vector<1x128xf32> to vector<16x128xf32>
    %68 = arith.addf %65, %67 : vector<16x128xf32>
    %cst_32 = arith.constant 0.000000e+00 : f32
    %69 = vector.broadcast %cst_32 : f32 to vector<16x128xf32>
    %70 = arith.maximumf %68, %69 : vector<16x128xf32>
    %c0_33 = arith.constant 0 : index
    %c0_34 = arith.constant 0 : index
    %71 = vector.load %arg10[%c0_33, %c0_34] : memref<16x128xf32, #tpu.memory_space<vmem>>, vector<16x128xf32>
    tpu.vector_store %arg10[%c0_33, %c0_34], %70 {strides = array<i32>} : memref<16x128xf32, #tpu.memory_space<vmem>>, vector<16x128xf32>,
    return
  }
  func.func @transform_0(%arg0: i32) -> (i32, i32) {
    %c0_i32 = arith.constant 0 : i32
    %c0_i32_0 = arith.constant 0 : i32
    return %arg0, %c0_i32 : i32, i32
  }
  func.func @transform_1(%arg0: i32) -> (i32, i32) {
    %c0_i32 = arith.constant 0 : i32
    %c0_i32_0 = arith.constant 0 : i32
    %c0_i32_1 = arith.constant 0 : i32
    return %c0_i32, %c0_i32_0 : i32, i32
  }
  func.func @transform_2(%arg0: i32) -> (i32, i32) {
    %c0_i32 = arith.constant 0 : i32
    %c0_i32_0 = arith.constant 0 : i32
    %c0_i32_1 = arith.constant 0 : i32
    return %c0_i32, %c0_i32_0 : i32, i32
  }
  func.func @transform_3(%arg0: i32) -> (i32, i32) {
    %c0_i32 = arith.constant 0 : i32
    %c0_i32_0 = arith.constant 0 : i32
    %c0_i32_1 = arith.constant 0 : i32
    return %c0_i32, %c0_i32_0 : i32, i32
  }
  func.func @transform_4(%arg0: i32) -> (i32, i32) {
    %c0_i32 = arith.constant 0 : i32
    %c0_i32_0 = arith.constant 0 : i32
    %c0_i32_1 = arith.constant 0 : i32
    return %c0_i32, %c0_i32_0 : i32, i32
  }
  func.func @transform_5(%arg0: i32) -> (i32, i32) {
    %c0_i32 = arith.constant 0 : i32
    %c0_i32_0 = arith.constant 0 : i32
    %c0_i32_1 = arith.constant 0 : i32
    return %c0_i32, %c0_i32_0 : i32, i32
  }
  func.func @transform_6(%arg0: i32) -> (i32, i32) {
    %c0_i32 = arith.constant 0 : i32
    %c0_i32_0 = arith.constant 0 : i32
    %c0_i32_1 = arith.constant 0 : i32
    return %c0_i32, %c0_i32_0 : i32, i32
  }
  func.func @transform_7(%arg0: i32) -> (i32, i32) {
    %c0_i32 = arith.constant 0 : i32
    %c0_i32_0 = arith.constant 0 : i32
    %c0_i32_1 = arith.constant 0 : i32
    return %c0_i32, %c0_i32_0 : i32, i32
  }
  func.func @transform_8(%arg0: i32) -> (i32, i32) {
    %c0_i32 = arith.constant 0 : i32
    %c0_i32_0 = arith.constant 0 : i32
    %c0_i32_1 = arith.constant 0 : i32
    return %c0_i32, %c0_i32_0 : i32, i32
  }
  func.func @transform_9(%arg0: i32) -> (i32, i32) {
    %c0_i32 = arith.constant 0 : i32
    %c0_i32_0 = arith.constant 0 : i32
    return %arg0, %c0_i32 : i32, i32
  }
}

</mosaic_0001>

<bundles_post_ra>
// kernel: soft_prompt_forward.1
= control target key start
LH: loop header
LB: loop body
LE: loop exit
PB: predicated region body
PF: predicated region fallthrough
CT: control target
= control target key end

     0   :  { %14 = vsyncpa [#allocation3], 0  ;;  %s663_s0 = inlined_call_operand.vmem [shape: f32[16,128], index: 0, kind: input, shape index: {}]   ;;  %s664_s1 = inlined_call_operand.hbm [shape: bf16[128,128], index: 1, kind: input, shape index: {}]   ;;  %s665_s2 = inlined_call_operand.vmem [shape: f32[1,128], index: 2, kind: input, shape index: {}]   ;;  %s666_s3 = inlined_call_operand.vmem [shape: f32[1,128], index: 3, kind: input, shape index: {}]   ;;  %s667_s4 = inlined_call_operand.vmem [shape: f32[1,128], index: 4, kind: input, shape index: {}]   ;;  %s668_s5 = inlined_call_operand.hbm [shape: bf16[128,128], index: 5, kind: input, shape index: {}]   ;;  %s669_s6 = inlined_call_operand.vmem [shape: f32[1,128], index: 6, kind: input, shape index: {}]   ;;  %s670_s7 = inlined_call_operand.vmem [shape: f32[1,128], index: 7, kind: input, shape index: {}]   ;;  %s671_s8 = inlined_call_operand.vmem [shape: f32[1,128], index: 8, kind: input, shape index: {}]   ;;  %s672_s9 = inlined_call_operand.vmem [shape: f32[16,128], index: 9, kind: output, shape index: {}]  }
   0x1   :  { %15 = vsyncpa [#allocation5], 0  ;;  %s542_s30 = smov [#allocation2]  }
   0x2   :  { %s23_s10 = sshll.u32 %s542_s30, 4  ;;  %s24_s10 = int_to_ptr.vmem [resolvable:$true] %s23_s10 }
   0x3   :  { %s506_s11 = scalar_lea.vmem %s24_s10, 1024  ;;  %p511_p1 = scmp.lt.s32.totalorder %s24_s10, %s24_s10 }
   0x4   :  { %p507_p0 = scmp.ne.s32.totalorder %s24_s10, %s506_s11  ;;  %p512_p2 = scmp.lt.s32.totalorder %s506_s11, %s506_s11 }
   0x6   :  { %p513_p3 = por %p512_p2, %p511_p1 }
   0x8   :  { %p514_p4 = pnand %p513_p3, %p507_p0 }
   0xa   :  { %517 = shalt.err (!%p514_p4)
}
   0xb   :  { %s543_s12 = smov 64   ;;  %s544_s13 = smov 4  }
   0xc   :  { %29 = dma.hbm_to_vmem [thread:$0]  %s664_s1, 1024, %s24_s10, [#allocation3], %s543_s12, %s543_s12, %s544_s13  }
   0xd   :  { %s545_s16 = smov [#allocation4]  }
   0xe   :  { %s41_s17 = sshll.u32 %s545_s16, 4  ;;  %s42_s17 = int_to_ptr.vmem [resolvable:$true] %s41_s17 }
   0xf   :  { %s526_s18 = scalar_lea.vmem %s42_s17, 1024  ;;  %p531_p6 = scmp.lt.s32.totalorder %s42_s17, %s42_s17 }
  0x10   :  { %p527_p5 = scmp.ne.s32.totalorder %s42_s17, %s526_s18  ;;  %p532_p7 = scmp.lt.s32.totalorder %s526_s18, %s526_s18 }
  0x12   :  { %p533_p8 = por %p532_p7, %p531_p6 }
  0x14   :  { %p534_p9 = pnand %p533_p8, %p527_p5 }
  0x16   :  { %537 = shalt.err (!%p534_p9)
}
  0x17   :  { %47 = dma.hbm_to_vmem [thread:$0]  %s668_s5, 1024, %s42_s17, [#allocation5], %s543_s12, %s543_s12, %s544_s13  }
  0x18   :  { %538 = dma.done.wait [#allocation3], 1024  }
  0x19   :  { %539 = vsyncadd [#allocation3], 4294966272 }
  0x1a   :  { %540 = dma.done.wait [#allocation5], 1024  }
  0x1b   :  { %541 = vsyncadd [#allocation5], 4294966272  ;;  %v546_v0 = vmov 0.0   ;;  %vm547_vm0 = vmmov 0   ;;  %v474_v1 = vld [vmem:[#allocation2 + $0x38] sm:$0xff]   ;;  %v475_v2 = vld [vmem:[#allocation2 + $0x30] sm:$0xff]   ;;  %v184_v19 = vlaneseq }
  0x1c   :  { %428 = vmatprep.subr.bf16.mxu0 %v546_v0  ;;  %444 = vmatprep.mubr.msk.bf16.mxu0 %vm547_vm0, %v546_v0  ;;  %v476_v3 = vld [vmem:[#allocation2 + $0x28] sm:$0xff]   ;;  %v477_v4 = vld [vmem:[#allocation2 + $0x20] sm:$0xff]   ;;  %v478_v5 = vld [vmem:[#allocation2 + $0x18] sm:$0xff]  }
  0x1d   :  { %448 = vmatprep.subr.bf16.mxu1 %v546_v0  ;;  %464 = vmatprep.mubr.msk.bf16.mxu1 %vm547_vm0, %v546_v0  ;;  %v479_v6 = vld [vmem:[#allocation2 + $0x10] sm:$0xff]   ;;  %v480_v7 = vld [vmem:[#allocation2 + $0x8] sm:$0xff]   ;;  %v481_v8 = vld [vmem:[#allocation2] sm:$0xff]   ;;  %v624_v20 = vand.u32 127, %v184_v19 }
  0x1e   :  { %429 = vmatpush3.bf16.msra.mxu0 %v474_v1  ;;  %v61_v9 = vld [vmem:[%s663_s0] sm:$0xff]  ;;  %v62_v10 = vld [vmem:[%s663_s0 + $0x8] sm:$0xff]  ;;  %v482_v31 = vld [vmem:[#allocation4 + $0x38] sm:$0xff]  }
  0x1f   :  { %430 = vmatprep.subr.bf16.mxu0 %v546_v0  ;;  %v79_v11 = vpack.c.bf16 %v62_v10, %v61_v9  ;;  %v388_v12 = vld [vmem:[%s665_s2] ss:$0 sm:$0xff]  ;;  %vm186_vm1 = vcmp.lt.s32.totalorder %v624_v20, 32  ;;  %449 = vmatpush3.bf16.msra.mxu1 %v482_v31  ;;  %v483_v32 = vld [vmem:[#allocation4 + $0x30] sm:$0xff]   ;;  %v484_v33 = vld [vmem:[#allocation4 + $0x28] sm:$0xff]  }
  0x20   :  { %450 = vmatprep.subr.bf16.mxu1 %v546_v0  ;;  %v485_v34 = vld [vmem:[#allocation4 + $0x20] sm:$0xff]   ;;  %v486_v35 = vld [vmem:[#allocation4 + $0x18] sm:$0xff]   ;;  %v487_v36 = vld [vmem:[#allocation4 + $0x10] sm:$0xff]  }
  0x21   :  { %v488_v37 = vld [vmem:[#allocation4 + $0x8] sm:$0xff]   ;;  %v489_v38 = vld [vmem:[#allocation4] sm:$0xff]  }
  0x22   :  { %431 = vmatpush3.bf16.msra.mxu0 %v475_v2  ;;  %v397_v46 = vld [vmem:[%s666_s3] ss:$0 sm:$0xff] }
  0x23   :  { %432 = vmatprep.subr.bf16.mxu0 %v546_v0  ;;  %451 = vmatpush3.bf16.msra.mxu1 %v483_v32  ;;  %v398_v50 = vld [vmem:[%s667_s4] ss:$0 sm:$0xff] }
  0x24   :  { %452 = vmatprep.subr.bf16.mxu1 %v546_v0  ;;  %v399_v58 = vld [vmem:[%s669_s6] ss:$0 sm:$0xff] }
  0x25   :  { %v409_v20 = vld [vmem:[%s671_s8] ss:$0 sm:$0xff] }
  0x26   :  { %433 = vmatpush3.bf16.msra.mxu0 %v476_v3 }
  0x27   :  { %434 = vmatprep.subr.bf16.mxu0 %v546_v0  ;;  %453 = vmatpush3.bf16.msra.mxu1 %v484_v33 }
  0x28   :  { %454 = vmatprep.subr.bf16.mxu1 %v546_v0 }
  0x2a   :  { %435 = vmatpush3.bf16.msra.mxu0 %v477_v4 }
  0x2b   :  { %436 = vmatprep.subr.bf16.mxu0 %v546_v0  ;;  %455 = vmatpush3.bf16.msra.mxu1 %v485_v34 }
  0x2c   :  { %456 = vmatprep.subr.bf16.mxu1 %v546_v0 }
  0x2e   :  { %437 = vmatpush3.bf16.msra.mxu0 %v478_v5 }
  0x2f   :  { %438 = vmatprep.subr.bf16.mxu0 %v546_v0  ;;  %457 = vmatpush3.bf16.msra.mxu1 %v486_v35 }
  0x30   :  { %458 = vmatprep.subr.bf16.mxu1 %v546_v0 }
  0x32   :  { %439 = vmatpush3.bf16.msra.mxu0 %v479_v6 }
  0x33   :  { %440 = vmatprep.subr.bf16.mxu0 %v546_v0  ;;  %459 = vmatpush3.bf16.msra.mxu1 %v487_v36 }
  0x34   :  { %460 = vmatprep.subr.bf16.mxu1 %v546_v0 }
  0x36   :  { %441 = vmatpush3.bf16.msra.mxu0 %v480_v7 }
  0x37   :  { %442 = vmatprep.subr.bf16.mxu0 %v546_v0  ;;  %461 = vmatpush3.bf16.msra.mxu1 %v488_v37 }
  0x38   :  { %462 = vmatprep.subr.bf16.mxu1 %v546_v0 }
  0x3a   :  { %443 = vmatpush3.bf16.msra.mxu0 %v481_v8 }
  0x3b   :  { %463 = vmatpush3.bf16.msra.mxu1 %v489_v38 }
  0x3d   :  { %445 = vmatmul.mubr.bf16.vlgmr.msra.gmra.mxu0 %v79_v11 }
  0xfd   :  { %v169_v13 = vpop.f32.mrf.mxu0 }
  0xfe   :  { %v170_v14 = vadd.f32 %v388_v12, %v169_v13 }
  0xff   :  { %v446_v15 = vpop.f32.mrf.mxu0 }
 0x100   :  { %176 = vadd.xlane.f32.xlu0 %v170_v14 }
 0x101   :  { %v172_v16 = vpop.f32.mrf.mxu0 }
 0x102   :  { %v173_v17 = vadd.f32 %v388_v12, %v172_v16 }
 0x103   :  { %v447_v18 = vpop.f32.mrf.mxu0 }
 0x104   :  { %178 = vadd.xlane.f32.xlu0 %v173_v17  ;;  %v408_v18 = vld [vmem:[%s670_s7] ss:$0 sm:$0xff] }
 0x189   :  { %v177_v21 = vpop.xlane.xlu0 %176 }
 0x18a   :  { %v180_v22 = vmul.f32 0.03125, %v177_v21 }
 0x18c   :  { %v182_v23 = vsub.f32 %v170_v14, %v180_v22 }
 0x18d   :  { %v179_v24 = vpop.xlane.xlu0 %178 }
 0x18e   :  { %v181_v25 = vmul.f32 0.03125, %v179_v24  ;;  %v187_v26 = vsel %vm186_vm1, %v182_v23, 0.0 }
 0x18f   :  { %v189_v27 = vmul.f32 %v187_v26, %v187_v26 }
 0x190   :  { %v183_v28 = vsub.f32 %v173_v17, %v181_v25 }
 0x191   :  { %191 = vadd.xlane.f32.xlu1 %v189_v27 }
 0x192   :  { %v188_v29 = vsel %vm186_vm1, %v183_v28, 0.0 }
 0x193   :  { %v190_v30 = vmul.f32 %v188_v29, %v188_v29 }
 0x195   :  { %193 = vadd.xlane.f32.xlu1 %v190_v30 }
 0x21a   :  { %v192_v39 = vpop.xlane.xlu1 %191 }
 0x21b   :  { %v195_v40 = vmul.f32 0.03125, %v192_v39 }
 0x21d   :  { %v197_v41 = vadd.f32 1e-05, %v195_v40 }
 0x21e   :  { %v194_v42 = vpop.xlane.xlu1 %193 }
 0x21f   :  { %490 = vrsqrt.f32 %v197_v41  ;;  %v196_v43 = vmul.f32 0.03125, %v194_v42 }
 0x221   :  { %v198_v44 = vadd.f32 1e-05, %v196_v43 }
 0x223   :  { %492 = vrsqrt.f32 %v198_v44 }
 0x22c   :  { %v491_v45 = vpop.eup %490 }
 0x22d   :  { %v201_v47 = vmul.f32 %v491_v45, %v182_v23 }
 0x22f   :  { %v210_v48 = vmul.f32 %v397_v46, %v201_v47 }
 0x230   :  { %v493_v49 = vpop.eup %492 }
 0x231   :  { %v202_v51 = vmul.f32 %v493_v49, %v183_v28  ;;  %v219_v53 = vadd.f32 %v398_v50, %v210_v48 }
 0x233   :  { %v211_v52 = vmul.f32 %v397_v46, %v202_v51  ;;  %v221_v55 = vmax.f32 %v219_v53, 0.0 }
 0x235   :  { %v220_v54 = vadd.f32 %v398_v50, %v211_v52 }
 0x237   :  { %v222_v56 = vmax.f32 %v220_v54, 0.0 }
 0x239   :  { %v239_v57 = vpack.c.bf16 %v222_v56, %v221_v55 }
 0x23b   :  { %465 = vmatmul.mubr.bf16.vlgmr.msra.gmra.mxu1 %v239_v57 }
 0x2fb   :  { %v329_v59 = vpop.f32.mrf.mxu1 }
 0x2fc   :  { %v330_v60 = vadd.f32 %v399_v58, %v329_v59 }
 0x2fd   :  { %v466_v61 = vpop.f32.mrf.mxu1 }
 0x2fe   :  { %336 = vadd.xlane.f32.xlu0 %v330_v60 }
 0x2ff   :  { %v332_v62 = vpop.f32.mrf.mxu1 }
 0x300   :  { %v333_v63 = vadd.f32 %v399_v58, %v332_v62 }
 0x301   :  { %v467_v0 = vpop.f32.mrf.mxu1 }
 0x302   :  { %338 = vadd.xlane.f32.xlu1 %v333_v63 }
 0x387   :  { %v337_v1 = vpop.xlane.xlu0 %336 }
 0x388   :  { %v340_v2 = vmul.f32 0.03125, %v337_v1 }
 0x38a   :  { %v342_v3 = vsub.f32 %v330_v60, %v340_v2 }
 0x38b   :  { %v339_v4 = vpop.xlane.xlu1 %338 }
 0x38c   :  { %v341_v5 = vmul.f32 0.03125, %v339_v4  ;;  %v344_v6 = vsel %vm186_vm1, %v342_v3, 0.0 }
 0x38d   :  { %v346_v7 = vmul.f32 %v344_v6, %v344_v6 }
 0x38e   :  { %v343_v8 = vsub.f32 %v333_v63, %v341_v5 }
 0x38f   :  { %348 = vadd.xlane.f32.xlu0 %v346_v7 }
 0x390   :  { %v345_v9 = vsel %vm186_vm1, %v343_v8, 0.0 }
 0x391   :  { %v347_v10 = vmul.f32 %v345_v9, %v345_v9 }
 0x393   :  { %350 = vadd.xlane.f32.xlu1 %v347_v10 }
 0x418   :  { %v349_v11 = vpop.xlane.xlu0 %348 }
 0x419   :  { %v352_v12 = vmul.f32 0.03125, %v349_v11 }
 0x41b   :  { %v354_v13 = vadd.f32 1e-05, %v352_v12 }
 0x41c   :  { %v351_v14 = vpop.xlane.xlu1 %350 }
 0x41d   :  { %494 = vrsqrt.f32 %v354_v13  ;;  %v353_v15 = vmul.f32 0.03125, %v351_v14 }
 0x41f   :  { %v355_v16 = vadd.f32 1e-05, %v353_v15 }
 0x421   :  { %496 = vrsqrt.f32 %v355_v16 }
 0x42a   :  { %v495_v17 = vpop.eup %494 }
 0x42b   :  { %v358_v19 = vmul.f32 %v495_v17, %v342_v3 }
 0x42d   :  { %v367_v21 = vmul.f32 %v408_v18, %v358_v19 }
 0x42e   :  { %v497_v22 = vpop.eup %496 }
 0x42f   :  { %v376_v23 = vadd.f32 %v409_v20, %v367_v21  ;;  %v359_v24 = vmul.f32 %v497_v22, %v343_v8 }
 0x431   :  { %v378_v25 = vmax.f32 %v376_v23, 0.0  ;;  %v368_v26 = vmul.f32 %v408_v18, %v359_v24 }
 0x433   :  { %380 = vst [vmem:[%s672_s9] sm:$0xff] %v378_v25  ;;  %v377_v27 = vadd.f32 %v409_v20, %v368_v26 }
 0x435   :  { %v379_v28 = vmax.f32 %v377_v27, 0.0 }
 0x437   :  { %381 = vst [vmem:[%s672_s9 + $0x8] sm:$0xff] %v379_v28 }
 0x438   :  { %386 = vsyncpa [#allocation3], 1 }
 0x439   :  { %387 = vsyncpa [#allocation5], 1 }

</bundles_post_ra>
